<compile_context>
chip_gen: v6e
topology: v6e:2x2x1
jax: 0.10.0
libtpu: 0.0.40
codegen_flags: <defaults>
</compile_context>

<pallas_src>
import functools

import jax
import jax.numpy as jnp
from jax.experimental import pallas as pl
from jax.experimental.pallas import tpu as pltpu

_LANE = 128


def _round_up(n, m):
    return ((n + m - 1) // m) * m


def _cdiv(a, b):
    return -(-a // b)


def _choose_batch_tiling(B, block_b):
    """Pick (tile_rows, padded_batch). >=2 grid steps when possible (v7x's two
    TensorCores), and minimal batch padding instead of rounding up to block_b."""
    b0 = _round_up(max(B, 8), 8)
    min_steps = 2 if b0 >= 16 else 1
    n_steps = max(min_steps, _cdiv(b0, max(block_b, 8)))
    tm = _round_up(_cdiv(b0, n_steps), 8)
    b_pad = _round_up(b0, tm)
    return tm, b_pad


def _vae_fused_kernel(x_ref, w1_ref, b1_ref, wmulv_ref, bmulv_ref,
                      wout_ref, bout_ref, eps_ref, out_bz_ref, out_ml_ref,
                      *, n_attr, l_p, d_out_ps, dout_tot, categorical):
    f32 = jnp.float32
    bf16 = jnp.bfloat16

    # ---- encode (all attributes at once): h1 = relu(fc1(x)) ----
    # bf16 operands on the MXU, f32 accumulation; elementwise math stays f32.
    x = x_ref[...]                                                  # bf16
    h1 = jnp.dot(x, w1_ref[...], preferred_element_type=f32) + b1_ref[...]
    h1 = jnp.maximum(h1, 0.0)

    # ---- fused fc_mu / fc_logvar: one block-diagonal matmul ----
    mulv = jnp.dot(h1.astype(bf16), wmulv_ref[...],
                   preferred_element_type=f32) + bmulv_ref[...]

    eps = eps_ref[...].astype(f32)

    # ---- reparameterize per attribute; stash mu/logvar into the f32 slab ----
    z_parts = []
    for a in range(n_attr):
        mu_a = mulv[:, 2 * a * l_p:2 * a * l_p + l_p]
        lv_a = mulv[:, 2 * a * l_p + l_p:2 * (a + 1) * l_p]
        z_a = mu_a + eps[:, a * l_p:(a + 1) * l_p] * jnp.exp(0.5 * lv_a)
        z_parts.append(z_a)
        out_ml_ref[:, a * l_p:(a + 1) * l_p] = mu_a
        out_ml_ref[:, (n_attr + a) * l_p:(n_attr + a + 1) * l_p] = lv_a
        out_bz_ref[:, dout_tot + a * l_p:dout_tot + (a + 1) * l_p] = (
            z_a.astype(bf16))

    z_all = z_parts[0] if n_attr == 1 else jnp.concatenate(z_parts, axis=1)

    # ---- decode (all attributes at once, block-diagonal fc_out) ----
    # Padded categorical columns are masked by the -1e30 baked into bout.
    logits = jnp.dot(z_all.astype(bf16), wout_ref[...],
                     preferred_element_type=f32) + bout_ref[...]

    off = 0
    for a in range(n_attr):
        la = logits[:, off:off + d_out_ps[a]]
        if categorical[a]:
            m = jnp.max(la, axis=1, keepdims=True)
            e = jnp.exp(la - m)
            recon_a = e / jnp.sum(e, axis=1, keepdims=True)   # exact normalizer
        else:
            # sigmoid(x) = 0.5*tanh(0.5*x) + 0.5 : single EUP op, exact.
            recon_a = 0.5 * jnp.tanh(0.5 * la) + 0.5
        out_bz_ref[:, off:off + d_out_ps[a]] = recon_a.astype(bf16)
        off += d_out_ps[a]


def vae_mrf_forward_fused(xs, params_list, eps_list, categorical_flags, *,
                          block_b=1024, vmem_limit_bytes=None):
    """Runs VariationalAutoencoder_MRF.forward for a list of attributes in ONE
    pallas_call (weights packed block-diagonally along the lane axis).
    Returns a list of (recon, z, mu, logvar), one tuple per attribute."""
    n = len(xs)
    assert n == len(params_list) == len(eps_list) == len(categorical_flags)
    f32, bf16 = jnp.float32, jnp.bfloat16

    B = xs[0].shape[0]
    L = params_list[0]["w_mu"].shape[1]
    l_p = _round_up(L, _LANE)

    d_ins = [int(x.shape[1]) for x in xs]
    d_outs = [int(p["w_out"].shape[1]) for p in params_list]
    d_in_ps = [_round_up(d, _LANE) for d in d_ins]
    d_out_ps = [_round_up(d, _LANE) for d in d_outs]
    din_tot = sum(d_in_ps)
    dout_tot = sum(d_out_ps)
    in_offs = [sum(d_in_ps[:a]) for a in range(n)]
    out_offs = [sum(d_out_ps[:a]) for a in range(n)]

    tm, b_pad = _choose_batch_tiling(B, block_b)
    grid = (b_pad // tm,)

    # ---- pack activations (streamed as bf16: halves the HBM read bytes) ----
    x_all = jnp.zeros((b_pad, din_tot), f32)
    eps_all = jnp.zeros((b_pad, n * l_p), f32)
    for a in range(n):
        x_all = x_all.at[:B, in_offs[a]:in_offs[a] + d_ins[a]].set(
            jnp.asarray(xs[a], f32))
        eps_all = eps_all.at[:B, a * l_p:a * l_p + L].set(
            jnp.asarray(eps_list[a], f32))
    x_all = x_all.astype(bf16)
    eps_all = eps_all.astype(bf16)

    # ---- pack weights block-diagonally (bf16 for the MXU), biases in f32 ----
    w1_all = jnp.zeros((din_tot, n * l_p), f32)
    b1_all = jnp.zeros((1, n * l_p), f32)
    wmulv_all = jnp.zeros((n * l_p, 2 * n * l_p), f32)
    bmulv_all = jnp.zeros((1, 2 * n * l_p), f32)
    wout_all = jnp.zeros((n * l_p, dout_tot), f32)
    bout_all = jnp.zeros((1, dout_tot), f32)
    for a, p in enumerate(params_list):
        w1_all = w1_all.at[in_offs[a]:in_offs[a] + d_ins[a],
                           a * l_p:a * l_p + L].set(jnp.asarray(p["w1"], f32))
        b1_all = b1_all.at[:, a * l_p:a * l_p + L].set(jnp.asarray(p["b1"], f32))
        r0, c0 = a * l_p, 2 * a * l_p
        wmulv_all = wmulv_all.at[r0:r0 + L, c0:c0 + L].set(
            jnp.asarray(p["w_mu"], f32))
        wmulv_all = wmulv_all.at[r0:r0 + L, c0 + l_p:c0 + l_p + L].set(
            jnp.asarray(p["w_logvar"], f32))
        bmulv_all = bmulv_all.at[:, c0:c0 + L].set(jnp.asarray(p["b_mu"], f32))
        bmulv_all = bmulv_all.at[:, c0 + l_p:c0 + l_p + L].set(
            jnp.asarray(p["b_logvar"], f32))
        wout_all = wout_all.at[r0:r0 + L,
                               out_offs[a]:out_offs[a] + d_outs[a]].set(
            jnp.asarray(p["w_out"], f32))
        bout_all = bout_all.at[:, out_offs[a]:out_offs[a] + d_outs[a]].set(
            jnp.asarray(p["b_out"], f32))
        if categorical_flags[a] and d_outs[a] < d_out_ps[a]:
            # Bake the softmax padding mask into the bias (padded w_out columns
            # are zero, so 0 + (-1e30) masks them) -> no iota/where in-kernel.
            bout_all = bout_all.at[:, out_offs[a] + d_outs[a]:
                                   out_offs[a] + d_out_ps[a]].set(-1e30)
    w1_all = w1_all.astype(bf16)
    wmulv_all = wmulv_all.astype(bf16)
    wout_all = wout_all.astype(bf16)

    kernel = functools.partial(
        _vae_fused_kernel, n_attr=n, l_p=l_p, d_out_ps=tuple(d_out_ps),
        dout_tot=dout_tot,
        categorical=tuple(bool(c) for c in categorical_flags))

    def tile_spec(width):
        # batch-tiled activations / outputs: stream over the grid.
        return pl.BlockSpec((tm, width), lambda i: (i, 0))

    def resident_spec(shape):
        # weights / biases: constant index_map -> stay VMEM-resident.
        return pl.BlockSpec(shape, lambda i: (0,) * len(shape))

    out_bz, out_ml = pl.pallas_call(
        kernel,
        out_shape=(jax.ShapeDtypeStruct((b_pad, dout_tot + n * l_p), bf16),
                   jax.ShapeDtypeStruct((b_pad, 2 * n * l_p), f32)),
        grid=grid,
        in_specs=[
            tile_spec(din_tot),                                       # x (bf16)
            resident_spec(w1_all.shape), resident_spec(b1_all.shape),
            resident_spec(wmulv_all.shape), resident_spec(bmulv_all.shape),
            resident_spec(wout_all.shape), resident_spec(bout_all.shape),
            tile_spec(n * l_p),                                       # eps (bf16)
        ],
        out_specs=(tile_spec(dout_tot + n * l_p),                     # [recon|z] bf16
                   tile_spec(2 * n * l_p)),                           # [mu|logvar] f32
        compiler_params=pltpu.CompilerParams(
            dimension_semantics=("parallel",),
            vmem_limit_bytes=vmem_limit_bytes),
    )(x_all, w1_all, b1_all, wmulv_all, bmulv_all, wout_all, bout_all, eps_all)

    results = []
    for a in range(n):
        recon = out_bz[:B, out_offs[a]:out_offs[a] + d_outs[a]].astype(f32)
        z = out_bz[:B, dout_tot + a * l_p:dout_tot + a * l_p + L].astype(f32)
        mu = out_ml[:B, a * l_p:a * l_p + L]
        logvar = out_ml[:B, (n + a) * l_p:(n + a) * l_p + L]
        results.append((recon, z, mu, logvar))
    return results


def vae_mrf_forward(x, params, eps, *, categorical=False, block_b=1024,
                    vmem_limit_bytes=None):
    """VariationalAutoencoder_MRF.forward(x, attribute) -> (recon, z, mu, logvar)."""
    (res,) = vae_mrf_forward_fused([x], [params], [eps], [categorical],
                                   block_b=block_b,
                                   vmem_limit_bytes=vmem_limit_bytes)
    return res


# ----------------------------- test helpers --------------------------------

def _init_linear(key, fan_in, fan_out):
    """nn.Linear-style init U(-1/sqrt(fan_in), 1/sqrt(fan_in)); weight stored
    pre-transposed as [fan_in, fan_out], bias as [1, fan_out]."""
    kw, kb = jax.random.split(key)
    bound = 1.0 / jnp.sqrt(jnp.float32(fan_in))
    w = jax.random.uniform(kw, (fan_in, fan_out), jnp.float32, -bound, bound)
    b = jax.random.uniform(kb, (1, fan_out), jnp.float32, -bound, bound)
    return w, b


def _reference_forward(x, p, eps, *, categorical=False, mirror_bf16=False):
    """Pure-JAX reference.  mirror_bf16=True mirrors the kernel's precision
    policy (bf16 matmul operands, f32 accumulation) for a tight comparison."""
    f32, bf16 = jnp.float32, jnp.bfloat16

    def cvt(a):
        return a.astype(bf16) if mirror_bf16 else a.astype(f32)

    h1 = jnp.maximum(
        jnp.dot(cvt(x), cvt(p["w1"]), preferred_element_type=f32) + p["b1"], 0.0)
    mu = jnp.dot(cvt(h1), cvt(p["w_mu"]), preferred_element_type=f32) + p["b_mu"]
    logvar = (jnp.dot(cvt(h1), cvt(p["w_logvar"]), preferred_element_type=f32)
              + p["b_logvar"])
    z = mu + cvt(eps).astype(f32) * jnp.exp(0.5 * logvar)
    logits = (jnp.dot(cvt(z), cvt(p["w_out"]), preferred_element_type=f32)
              + p["b_out"])
    recon = jax.nn.softmax(logits, axis=1) if categorical else jax.nn.sigmoid(logits)
    return recon, z, mu, logvar


def _maxdiff(a, b):
    return float(jnp.max(jnp.abs(a.astype(jnp.float32) - b.astype(jnp.float32))))


def _check_tight(got, ref, name):
    """Tight check vs the bf16-mirrored reference (recon/z travel via bf16 HBM
    slab, so the reference is rounded to bf16 for those two)."""
    recon, z, mu, logvar = got
    r_recon, r_z, r_mu, r_lv = ref
    for g, r in zip(got, ref):
        assert g.shape == r.shape, name
    assert _maxdiff(recon, r_recon.astype(jnp.bfloat16)) < 1e-2, name
    assert _maxdiff(z, r_z.astype(jnp.bfloat16)) < 3e-2, name
    assert _maxdiff(mu, r_mu) < 2e-3, name
    assert _maxdiff(logvar, r_lv) < 2e-3, name


def _check_loose(got, ref_f32, name):
    """Coarse semantic guard vs the exact-f32 module reference (bounds the
    total bf16-narrowing error)."""
    tols = (0.1, 0.2, 0.1, 0.1)
    for g, r, t in zip(got, ref_f32, tols):
        assert _maxdiff(g, r) < t, name


if __name__ == "__main__":
    B, LATENT = 8, 32
    key = jax.random.PRNGKey(0)

    def make_attr(k, d_in):
        ks = jax.random.split(k, 6)
        x = jax.random.uniform(ks[0], (B, d_in), jnp.float32)
        eps = jax.random.normal(ks[1], (B, LATENT), jnp.float32)
        w1, b1 = _init_linear(ks[2], d_in, LATENT)        # fc1<a>
        wmu, bmu = _init_linear(ks[3], LATENT, LATENT)    # fc_mu<a>
        wlv, blv = _init_linear(ks[4], LATENT, LATENT)    # fc_logvar<a>
        wout, bout = _init_linear(ks[5], LATENT, d_in)    # fc_out<a>
        params = {"w1": w1, "b1": b1, "w_mu": wmu, "b_mu": bmu,
                  "w_logvar": wlv, "b_logvar": blv,
                  "w_out": wout, "b_out": bout}
        return x, params, eps

    k_a, k_b, k_c = jax.random.split(key, 3)
    attr_a = make_attr(k_a, 16)   # real var   -> sigmoid decode
    attr_b = make_attr(k_b, 24)   # cat var    -> softmax decode
    attr_c = make_attr(k_c, 10)   # real var   -> sigmoid decode

    # --- single-attribute forward (module.forward(x, a), sigmoid branch) ---
    x, params, eps = attr_a
    out = vae_mrf_forward(x, params, eps, categorical=False)
    jax.block_until_ready(out)
    _check_tight(out, _reference_forward(x, params, eps, categorical=False,
                                         mirror_bf16=True), "single/sigmoid")
    _check_loose(out, _reference_forward(x, params, eps, categorical=False,
                                         mirror_bf16=False), "single/sigmoid")

    # --- single-attribute forward, categorical (softmax) branch ---
    x, params, eps = attr_b
    out_c = vae_mrf_forward(x, params, eps, categorical=True)
    jax.block_until_ready(out_c)
    _check_tight(out_c, _reference_forward(x, params, eps, categorical=True,
                                           mirror_bf16=True), "single/softmax")
    _check_loose(out_c, _reference_forward(x, params, eps, categorical=True,
                                           mirror_bf16=False), "single/softmax")
    assert float(jnp.max(jnp.abs(jnp.sum(out_c[0], axis=1) - 1.0))) < 3e-2

    # --- fused: all three attributes in ONE pallas_call ---
    xs = [attr_a[0], attr_b[0], attr_c[0]]
    ps = [attr_a[1], attr_b[1], attr_c[1]]
    es = [attr_a[2], attr_b[2], attr_c[2]]
    flags = [False, True, False]
    fused = vae_mrf_forward_fused(xs, ps, es, flags)
    jax.block_until_ready(fused)
    for i, cat in enumerate(flags):
        ref = _reference_forward(xs[i], ps[i], es[i], categorical=cat,
                                 mirror_bf16=True)
        _check_tight(fused[i], ref, f"fused/attr{i}")

    print("KERNEL_OK")
</pallas_src>

<mosaic_0001>
module attributes {stable_mosaic.version = 11 : i64} {
  func.func @_vae_fused_kernel(%arg0: i32, %arg1: memref<8x128xbf16, #tpu.memory_space<vmem>>, %arg2: memref<128x128xbf16, #tpu.memory_space<vmem>>, %arg3: memref<1x128xf32, #tpu.memory_space<vmem>>, %arg4: memref<128x256xbf16, #tpu.memory_space<vmem>>, %arg5: memref<1x256xf32, #tpu.memory_space<vmem>>, %arg6: memref<128x128xbf16, #tpu.memory_space<vmem>>, %arg7: memref<1x128xf32, #tpu.memory_space<vmem>>, %arg8: memref<8x128xbf16, #tpu.memory_space<vmem>>, %arg9: memref<8x256xbf16, #tpu.memory_space<vmem>>, %arg10: memref<8x256xf32, #tpu.memory_space<vmem>>) attributes {dimension_semantics = [#tpu.dimension_semantics<parallel>], iteration_bounds = array<i64: 1>, scalar_prefetch = 0 : i64, scratch_operands = 0 : i64, tpu.core_type = #tpu.core_type<tc>, window_params = [{transform_indices = @transform_0, window_bounds = array<i64: 8, 128>}, {pipeline_mode = #tpu.pipeline_mode<synchronous>, transform_indices = @transform_1, window_bounds = array<i64: 128, 128>}, {pipeline_mode = #tpu.pipeline_mode<synchronous>, transform_indices = @transform_2, window_bounds = array<i64: 1, 128>}, {pipeline_mode = #tpu.pipeline_mode<synchronous>, transform_indices = @transform_3, window_bounds = array<i64: 128, 256>}, {pipeline_mode = #tpu.pipeline_mode<synchronous>, transform_indices = @transform_4, window_bounds = array<i64: 1, 256>}, {pipeline_mode = #tpu.pipeline_mode<synchronous>, transform_indices = @transform_5, window_bounds = array<i64: 128, 128>}, {pipeline_mode = #tpu.pipeline_mode<synchronous>, transform_indices = @transform_6, window_bounds = array<i64: 1, 128>}, {transform_indices = @transform_7, window_bounds = array<i64: 8, 128>}, {transform_indices = @transform_8, window_bounds = array<i64: 8, 256>}, {transform_indices = @transform_9, window_bounds = array<i64: 8, 256>}]} {
    %c0 = arith.constant 0 : index
    %c0_0 = arith.constant 0 : index
    %0 = vector.load %arg1[%c0, %c0_0] : memref<8x128xbf16, #tpu.memory_space<vmem>>, vector<8x128xbf16>
    %c0_1 = arith.constant 0 : index
    %c0_2 = arith.constant 0 : index
    %1 = vector.load %arg2[%c0_1, %c0_2] : memref<128x128xbf16, #tpu.memory_space<vmem>>, vector<128x128xbf16>
    %cst = arith.constant dense<0.000000e+00> : vector<8x128xf32>
    %2 = tpu.matmul %0, %1, %cst {dimension_numbers = #tpu.dot_dimension_numbers<[1], [0], [0], [1], [0, 0, 1, 1], [], []>} : vector<8x128xbf16>, vector<128x128xbf16>, vector<8x128xf32> -> vector<8x128xf32>
    %c0_3 = arith.constant 0 : index
    %c0_4 = arith.constant 0 : index
    %3 = vector.load %arg3[%c0_3, %c0_4] : memref<1x128xf32, #tpu.memory_space<vmem>>, vector<1x128xf32>
    %4 = vector.broadcast %3 : vector<1x128xf32> to vector<8x128xf32>
    %5 = arith.addf %2, %4 : vector<8x128xf32>
    %cst_5 = arith.constant 0.000000e+00 : f32
    %6 = vector.broadcast %cst_5 : f32 to vector<8x128xf32>
    %7 = arith.maximumf %5, %6 : vector<8x128xf32>
    %8 = arith.truncf %7 : vector<8x128xf32> to vector<8x128xbf16>
    %c0_6 = arith.constant 0 : index
    %c0_7 = arith.constant 0 : index
    %9 = vector.load %arg4[%c0_6, %c0_7] : memref<128x256xbf16, #tpu.memory_space<vmem>>, vector<128x256xbf16>
    %cst_8 = arith.constant dense<0.000000e+00> : vector<8x256xf32>
    %10 = tpu.matmul %8, %9, %cst_8 {dimension_numbers = #tpu.dot_dimension_numbers<[1], [0], [0], [1], [0, 0, 1, 1], [], []>} : vector<8x128xbf16>, vector<128x256xbf16>, vector<8x256xf32> -> vector<8x256xf32>
    %c0_9 = arith.constant 0 : index
    %c0_10 = arith.constant 0 : index
    %11 = vector.load %arg5[%c0_9, %c0_10] : memref<1x256xf32, #tpu.memory_space<vmem>>, vector<1x256xf32>
    %12 = vector.broadcast %11 : vector<1x256xf32> to vector<8x256xf32>
    %13 = arith.addf %10, %12 : vector<8x256xf32>
    %c0_11 = arith.constant 0 : index
    %c0_12 = arith.constant 0 : index
    %14 = vector.load %arg8[%c0_11, %c0_12] : memref<8x128xbf16, #tpu.memory_space<vmem>>, vector<8x128xbf16>
    %15 = arith.extf %14 : vector<8x128xbf16> to vector<8x128xf32>
    %16 = vector.extract_strided_slice %13 {offsets = [0, 0], sizes = [8, 128], strides = [1, 1]} : vector<8x256xf32> to vector<8x128xf32>
    %17 = vector.extract_strided_slice %13 {offsets = [0, 128], sizes = [8, 128], strides = [1, 1]} : vector<8x256xf32> to vector<8x128xf32>
    %cst_13 = arith.constant 5.000000e-01 : f32
    %18 = vector.broadcast %cst_13 : f32 to vector<8x128xf32>
    %19 = arith.mulf %18, %17 : vector<8x128xf32>
    %20 = math.exp %19 : vector<8x128xf32>
    %21 = arith.mulf %15, %20 : vector<8x128xf32>
    %22 = arith.addf %16, %21 : vector<8x128xf32>
    %c0_14 = arith.constant 0 : index
    %c0_15 = arith.constant 0 : index
    %23 = vector.load %arg10[%c0_14, %c0_15] : memref<8x256xf32, #tpu.memory_space<vmem>>, vector<8x128xf32>
    tpu.vector_store %arg10[%c0_14, %c0_15], %16 {strides = array<i32>} : memref<8x256xf32, #tpu.memory_space<vmem>>, vector<8x128xf32>,
    %c0_16 = arith.constant 0 : index
    %c128 = arith.constant 128 : index
    %24 = vector.load %arg10[%c0_16, %c128] : memref<8x256xf32, #tpu.memory_space<vmem>>, vector<8x128xf32>
    tpu.vector_store %arg10[%c0_16, %c128], %17 {strides = array<i32>} : memref<8x256xf32, #tpu.memory_space<vmem>>, vector<8x128xf32>,
    %25 = arith.truncf %22 : vector<8x128xf32> to vector<8x128xbf16>
    %c0_17 = arith.constant 0 : index
    %c128_18 = arith.constant 128 : index
    %26 = vector.load %arg9[%c0_17, %c128_18] : memref<8x256xbf16, #tpu.memory_space<vmem>>, vector<8x128xbf16>
    tpu.vector_store %arg9[%c0_17, %c128_18], %25 {strides = array<i32>} : memref<8x256xbf16, #tpu.memory_space<vmem>>, vector<8x128xbf16>,
    %27 = arith.truncf %22 : vector<8x128xf32> to vector<8x128xbf16>
    %c0_19 = arith.constant 0 : index
    %c0_20 = arith.constant 0 : index
    %28 = vector.load %arg6[%c0_19, %c0_20] : memref<128x128xbf16, #tpu.memory_space<vmem>>, vector<128x128xbf16>
    %cst_21 = arith.constant dense<0.000000e+00> : vector<8x128xf32>
    %29 = tpu.matmul %27, %28, %cst_21 {dimension_numbers = #tpu.dot_dimension_numbers<[1], [0], [0], [1], [0, 0, 1, 1], [], []>} : vector<8x128xbf16>, vector<128x128xbf16>, vector<8x128xf32> -> vector<8x128xf32>
    %c0_22 = arith.constant 0 : index
    %c0_23 = arith.constant 0 : index
    %30 = vector.load %arg7[%c0_22, %c0_23] : memref<1x128xf32, #tpu.memory_space<vmem>>, vector<1x128xf32>
    %31 = vector.broadcast %30 : vector<1x128xf32> to vector<8x128xf32>
    %32 = arith.addf %29, %31 : vector<8x128xf32>
    %cst_24 = arith.constant 5.000000e-01 : f32
    %33 = vector.broadcast %cst_24 : f32 to vector<8x128xf32>
    %34 = arith.mulf %33, %32 : vector<8x128xf32>
    %35 = math.tanh %34 : vector<8x128xf32>
    %cst_25 = arith.constant 5.000000e-01 : f32
    %36 = vector.broadcast %cst_25 : f32 to vector<8x128xf32>
    %37 = arith.mulf %36, %35 : vector<8x128xf32>
    %cst_26 = arith.constant 5.000000e-01 : f32
    %38 = vector.broadcast %cst_26 : f32 to vector<8x128xf32>
    %39 = arith.addf %37, %38 : vector<8x128xf32>
    %40 = arith.truncf %39 : vector<8x128xf32> to vector<8x128xbf16>
    %c0_27 = arith.constant 0 : index
    %c0_28 = arith.constant 0 : index
    %41 = vector.load %arg9[%c0_27, %c0_28] : memref<8x256xbf16, #tpu.memory_space<vmem>>, vector<8x128xbf16>
    tpu.vector_store %arg9[%c0_27, %c0_28], %40 {strides = array<i32>} : memref<8x256xbf16, #tpu.memory_space<vmem>>, vector<8x128xbf16>,
    return
  }
  func.func @transform_0(%arg0: i32) -> (i32, i32) {
    %c0_i32 = arith.constant 0 : i32
    %c0_i32_0 = arith.constant 0 : i32
    return %arg0, %c0_i32 : i32, i32
  }
  func.func @transform_1(%arg0: i32) -> (i32, i32) {
    %c0_i32 = arith.constant 0 : i32
    %c0_i32_0 = arith.constant 0 : i32
    %c0_i32_1 = arith.constant 0 : i32
    return %c0_i32, %c0_i32_0 : i32, i32
  }
  func.func @transform_2(%arg0: i32) -> (i32, i32) {
    %c0_i32 = arith.constant 0 : i32
    %c0_i32_0 = arith.constant 0 : i32
    %c0_i32_1 = arith.constant 0 : i32
    return %c0_i32, %c0_i32_0 : i32, i32
  }
  func.func @transform_3(%arg0: i32) -> (i32, i32) {
    %c0_i32 = arith.constant 0 : i32
    %c0_i32_0 = arith.constant 0 : i32
    %c0_i32_1 = arith.constant 0 : i32
    return %c0_i32, %c0_i32_0 : i32, i32
  }
  func.func @transform_4(%arg0: i32) -> (i32, i32) {
    %c0_i32 = arith.constant 0 : i32
    %c0_i32_0 = arith.constant 0 : i32
    %c0_i32_1 = arith.constant 0 : i32
    return %c0_i32, %c0_i32_0 : i32, i32
  }
  func.func @transform_5(%arg0: i32) -> (i32, i32) {
    %c0_i32 = arith.constant 0 : i32
    %c0_i32_0 = arith.constant 0 : i32
    %c0_i32_1 = arith.constant 0 : i32
    return %c0_i32, %c0_i32_0 : i32, i32
  }
  func.func @transform_6(%arg0: i32) -> (i32, i32) {
    %c0_i32 = arith.constant 0 : i32
    %c0_i32_0 = arith.constant 0 : i32
    %c0_i32_1 = arith.constant 0 : i32
    return %c0_i32, %c0_i32_0 : i32, i32
  }
  func.func @transform_7(%arg0: i32) -> (i32, i32) {
    %c0_i32 = arith.constant 0 : i32
    %c0_i32_0 = arith.constant 0 : i32
    return %arg0, %c0_i32 : i32, i32
  }
  func.func @transform_8(%arg0: i32) -> (i32, i32) {
    %c0_i32 = arith.constant 0 : i32
    %c0_i32_0 = arith.constant 0 : i32
    return %arg0, %c0_i32 : i32, i32
  }
  func.func @transform_9(%arg0: i32) -> (i32, i32) {
    %c0_i32 = arith.constant 0 : i32
    %c0_i32_0 = arith.constant 0 : i32
    return %arg0, %c0_i32 : i32, i32
  }
}

</mosaic_0001>

<bundles_post_ra>
// kernel: tpu_custom_call.1
= control target key start
LH: loop header
LB: loop body
LE: loop exit
PB: predicated region body
PF: predicated region fallthrough
CT: control target
= control target key end

     0   :  { %15 = vsyncpa [#allocation3], 0  ;;  %s907_s0 = inlined_call_operand.hbm [shape: bf16[8,128], index: 0, kind: input, shape index: {}]   ;;  %s908_s1 = inlined_call_operand.hbm [shape: bf16[128,128], index: 1, kind: input, shape index: {}]   ;;  %s909_s2 = inlined_call_operand.vmem [shape: f32[1,128], index: 2, kind: input, shape index: {}]   ;;  %s910_s3 = inlined_call_operand.hbm [shape: bf16[128,256], index: 3, kind: input, shape index: {}]   ;;  %s911_s4 = inlined_call_operand.vmem [shape: f32[1,256], index: 4, kind: input, shape index: {}]   ;;  %s912_s5 = inlined_call_operand.hbm [shape: bf16[128,128], index: 5, kind: input, shape index: {}]   ;;  %s913_s6 = inlined_call_operand.vmem [shape: f32[1,128], index: 6, kind: input, shape index: {}]   ;;  %s914_s7 = inlined_call_operand.vmem [shape: bf16[8,128], index: 7, kind: input, shape index: {}]   ;;  %s915_s8 = inlined_call_operand.hbm [shape: bf16[8,256], index: 8, kind: output, shape index: {0}]   ;;  %s916_s9 = inlined_call_operand.hbm [shape: f32[8,256], index: 9, kind: output, shape index: {1}]  }
   0x1   :  { %16 = vsyncpa [#allocation6], 0 }
   0x2   :  { %17 = vsyncpa [#allocation9], 0 }
   0x3   :  { %18 = vsyncpa [#allocation4], 0 }
   0x4   :  { %19 = vsyncpa [#allocation12], 0  ;;  %s788_s30 = smov [#allocation5]  }
   0x5   :  { %s35_s10 = sshll.u32 %s788_s30, 4  ;;  %s36_s10 = int_to_ptr.vmem [resolvable:$true] %s35_s10 }
   0x6   :  { %s666_s11 = scalar_lea.vmem %s36_s10, 1024  ;;  %p671_p1 = scmp.lt.s32.totalorder %s36_s10, %s36_s10 }
   0x7   :  { %p667_p0 = scmp.ne.s32.totalorder %s36_s10, %s666_s11  ;;  %p672_p2 = scmp.lt.s32.totalorder %s666_s11, %s666_s11 }
   0x9   :  { %p673_p3 = por %p672_p2, %p671_p1 }
   0xb   :  { %p674_p4 = pnand %p673_p3, %p667_p0 }
   0xd   :  { %677 = shalt.err (!%p674_p4)
}
   0xe   :  { %s789_s12 = smov 64   ;;  %s790_s13 = smov 4  }
   0xf   :  { %41 = dma.hbm_to_vmem [thread:$0]  %s908_s1, 1024, %s36_s10, [#allocation6], %s789_s12, %s789_s12, %s790_s13  }
  0x10   :  { %s791_s16 = smov [#allocation2]   ;;  %s792_s18 = smov [#allocation7]  }
  0x11   :  { %s26_s17 = sshll.u32 %s791_s16, 4  ;;  %s49_s19 = sshll.u32 %s792_s18, 4  ;;  %s27_s17 = int_to_ptr.vmem [resolvable:$true] %s26_s17  ;;  %s50_s19 = int_to_ptr.vmem [resolvable:$true] %s49_s19 }
  0x12   :  { %s686_s20 = scalar_lea.vmem %s27_s17, 64  ;;  %p691_p6 = scmp.lt.s32.totalorder %s27_s17, %s27_s17 }
  0x13   :  { %p687_p5 = scmp.ne.s32.totalorder %s27_s17, %s686_s20  ;;  %p692_p7 = scmp.lt.s32.totalorder %s686_s20, %s686_s20 }
  0x15   :  { %p693_p8 = por %p692_p7, %p691_p6 }
  0x17   :  { %p694_p9 = pnand %p693_p8, %p687_p5 }
  0x19   :  { %697 = shalt.err (!%p694_p9)
}
  0x1a   :  { %29 = dma.hbm_to_vmem [thread:$0]  %s907_s0, 64, %s27_s17, [#allocation3]  }
  0x1b   :  { %s706_s23 = scalar_lea.vmem %s50_s19, 2048  ;;  %p711_p11 = scmp.lt.s32.totalorder %s50_s19, %s50_s19 }
  0x1c   :  { %p707_p10 = scmp.ne.s32.totalorder %s50_s19, %s706_s23  ;;  %p712_p12 = scmp.lt.s32.totalorder %s706_s23, %s706_s23 }
  0x1e   :  { %p713_p13 = por %p712_p12, %p711_p11 }
  0x20   :  { %p714_p0 = pnand %p713_p13, %p707_p10 }
  0x22   :  { %717 = shalt.err (!%p714_p0)
}
  0x23   :  { %s793_s1 = smov 128   ;;  %s794_s24 = smov 8  }
  0x24   :  { %55 = dma.hbm_to_vmem [thread:$0]  %s910_s3, 2048, %s50_s19, [#allocation6], %s793_s1, %s793_s1, %s794_s24  }
  0x25   :  { %s795_s27 = smov [#allocation8]  }
  0x26   :  { %s63_s28 = sshll.u32 %s795_s27, 4  ;;  %s64_s28 = int_to_ptr.vmem [resolvable:$true] %s63_s28 }
  0x27   :  { %s726_s29 = scalar_lea.vmem %s64_s28, 1024  ;;  %p731_p2 = scmp.lt.s32.totalorder %s64_s28, %s64_s28 }
  0x28   :  { %p727_p1 = scmp.ne.s32.totalorder %s64_s28, %s726_s29  ;;  %p732_p3 = scmp.lt.s32.totalorder %s726_s29, %s726_s29 }
  0x2a   :  { %p733_p4 = por %p732_p3, %p731_p2 }
  0x2c   :  { %p734_p5 = pnand %p733_p4, %p727_p1 }
  0x2e   :  { %737 = shalt.err (!%p734_p5)
}
  0x2f   :  { %69 = dma.hbm_to_vmem [thread:$0]  %s912_s5, 1024, %s64_s28, [#allocation9], %s789_s12, %s789_s12, %s790_s13  }
  0x30   :  { %778 = dma.done.wait [#allocation3], 64  }
  0x31   :  { %779 = vsyncadd [#allocation3], 4294967232 }
  0x32   :  { %780 = dma.done.wait [#allocation6], 3072  }
  0x33   :  { %781 = vsyncadd [#allocation6], 4294964224 }
  0x34   :  { %782 = dma.done.wait [#allocation9], 1024  }
  0x35   :  { %783 = vsyncadd [#allocation9], 4294966272  ;;  %v796_v0 = vmov 0.0   ;;  %vm797_vm0 = vmmov 0   ;;  %v614_v1 = vld [vmem:[#allocation5 + $0x38] sm:$0xff]   ;;  %v615_v2 = vld [vmem:[#allocation5 + $0x30] sm:$0xff]   ;;  %v219_v43 = vlaneseq }
  0x36   :  { %561 = vmatprep.subr.bf16.mxu0 %v796_v0  ;;  %577 = vmatprep.mubr.msk.bf16.mxu0 %vm797_vm0, %v796_v0  ;;  %v616_v3 = vld [vmem:[#allocation5 + $0x28] sm:$0xff]   ;;  %v622_v4 = vld [vmem:[#allocation7 + $0x74] ss:$8 sps:$4 sm:$0xff]   ;;  %v624_v5 = vld [vmem:[#allocation7 + $0x70] ss:$8 sps:$4 sm:$0xff]   ;;  %v798_v26 = vmov 0  }
  0x37   :  { %562 = vmatpush3.bf16.msra.mxu0 %v614_v1  ;;  %v617_v6 = vld [vmem:[#allocation5 + $0x20] sm:$0xff]   ;;  %309 = vmatprep.subr.bf16.mxu1 %v622_v4  ;;  %v628_v9 = vld [vmem:[#allocation7 + $0x54] ss:$8 sps:$4 sm:$0xff]   ;;  %v630_v11 = vld [vmem:[#allocation7 + $0x50] ss:$8 sps:$4 sm:$0xff]   ;;  %v220_v44 = vshrl.u32 %v219_v43, 7 }
  0x38   :  { %563 = vmatprep.subr.bf16.mxu0 %v796_v0  ;;  %v625_v7 = vld [vmem:[#allocation7 + $0x64] ss:$8 sps:$4 sm:$0xff]   ;;  %310 = vmatpush1.bf16.msra.mxu1 %v624_v5  ;;  %v627_v8 = vld [vmem:[#allocation7 + $0x60] ss:$8 sps:$4 sm:$0xff]   ;;  %v618_v10 = vld [vmem:[#allocation5 + $0x18] sm:$0xff]  }
  0x39   :  { %311 = vmatprep.subr.bf16.mxu1 %v625_v7  ;;  %v619_v12 = vld [vmem:[#allocation5 + $0x10] sm:$0xff]   ;;  %v631_v13 = vld [vmem:[#allocation7 + $0x44] ss:$8 sps:$4 sm:$0xff]   ;;  %v633_v14 = vld [vmem:[#allocation7 + $0x40] ss:$8 sps:$4 sm:$0xff]   ;;  %341 = vmatprep.mubr.bf16.mxu1 %v798_v26  ;;  %v221_v45 = vsub.s32 0, %v220_v44 }
  0x3a   :  { %v634_v15 = vld [vmem:[#allocation7 + $0x34] ss:$8 sps:$4 sm:$0xff]   ;;  %v620_v16 = vld [vmem:[#allocation5 + $0x8] sm:$0xff]   ;;  %v636_v17 = vld [vmem:[#allocation7 + $0x30] ss:$8 sps:$4 sm:$0xff]   ;;  %v225_v47 = vsub.s32 1, %v220_v44 }
  0x3b   :  { %564 = vmatpush3.bf16.msra.mxu0 %v615_v2  ;;  %v637_v18 = vld [vmem:[#allocation7 + $0x24] ss:$8 sps:$4 sm:$0xff]   ;;  %v639_v20 = vld [vmem:[#allocation7 + $0x20] ss:$8 sps:$4 sm:$0xff]   ;;  %v640_v21 = vld [vmem:[#allocation7 + $0x14] ss:$8 sps:$4 sm:$0xff]  }
  0x3c   :  { %565 = vmatprep.subr.bf16.mxu0 %v796_v0  ;;  %312 = vmatpush1.bf16.msra.mxu1 %v627_v8  ;;  %v621_v19 = vld [vmem:[#allocation5] sm:$0xff]   ;;  %v87_v22 = vld [vmem:[#allocation2] sm:$0xf]  ;;  %v642_v23 = vld [vmem:[#allocation7 + $0x10] ss:$8 sps:$4 sm:$0xff]  }
  0x3d   :  { %313 = vmatprep.subr.bf16.mxu1 %v628_v9  ;;  %v643_v24 = vld [vmem:[#allocation7 + $0x4] ss:$8 sps:$4 sm:$0xff]   ;;  %v645_v25 = vld [vmem:[#allocation7] ss:$8 sps:$4 sm:$0xff]   ;;  %v646_v27 = vld [vmem:[#allocation8 + $0x38] sm:$0xff]  }
  0x3e   :  { %v509_v28 = vld [vmem:[%s909_s2] ss:$0 sm:$0xff]  ;;  %v647_v36 = vld [vmem:[#allocation8 + $0x30] sm:$0xff]   ;;  %v648_v37 = vld [vmem:[#allocation8 + $0x28] sm:$0xff]  }
  0x3f   :  { %566 = vmatpush3.bf16.msra.mxu0 %v616_v3  ;;  %v649_v38 = vld [vmem:[#allocation8 + $0x20] sm:$0xff]   ;;  %v650_v39 = vld [vmem:[#allocation8 + $0x18] sm:$0xff]   ;;  %v651_v40 = vld [vmem:[#allocation8 + $0x10] sm:$0xff]  }
  0x40   :  { %567 = vmatprep.subr.bf16.mxu0 %v796_v0  ;;  %314 = vmatpush1.bf16.msra.mxu1 %v630_v11  ;;  %v652_v41 = vld [vmem:[#allocation8 + $0x8] sm:$0xff]   ;;  %v653_v42 = vld [vmem:[#allocation8] sm:$0xff]   ;;  %v217_v46 = vld [vmem:[%s911_s4] sm:$0x3]  ;;  %s799_s4 = smov [#allocation11]  }
  0x41   :  { %315 = vmatprep.subr.bf16.mxu1 %v631_v13  ;;  %v222_v48 = vrot.slane %v217_v46, %v221_v45  ;;  %v226_v49 = vrot.slane %v217_v46, %v225_v47  ;;  %v350_v58 = vld [vmem:[%s914_s7] sm:$0xf]  ;;  %s494_s13 = sshll.u32 %s799_s4, 4  ;;  %s495_s13 = int_to_ptr.vmem [resolvable:$true] %s494_s13 }
  0x42   :  { %v351_v59 = vunpack.c.l.bf16 %v350_v58  ;;  %s738_s14 = scalar_lea.vmem %s495_s13, 256  ;;  %p743_p7 = scmp.lt.s32.totalorder %s495_s13, %s495_s13 }
  0x43   :  { %568 = vmatpush3.bf16.msra.mxu0 %v617_v6  ;;  %p739_p6 = scmp.ne.s32.totalorder %s495_s13, %s738_s14  ;;  %p744_p8 = scmp.lt.s32.totalorder %s738_s14, %s738_s14 }
  0x44   :  { %569 = vmatprep.subr.bf16.mxu0 %v796_v0  ;;  %316 = vmatpush1.bf16.msra.mxu1 %v633_v14 }
  0x45   :  { %317 = vmatprep.subr.bf16.mxu1 %v634_v15  ;;  %p745_p9 = por %p744_p8, %p743_p7 }
  0x47   :  { %570 = vmatpush3.bf16.msra.mxu0 %v618_v10  ;;  %p746_p10 = pnand %p745_p9, %p739_p6 }
  0x48   :  { %571 = vmatprep.subr.bf16.mxu0 %v796_v0  ;;  %318 = vmatpush1.bf16.msra.mxu1 %v636_v17 }
  0x49   :  { %319 = vmatprep.subr.bf16.mxu1 %v637_v18 }
  0x4b   :  { %572 = vmatpush3.bf16.msra.mxu0 %v619_v12 }
  0x4c   :  { %573 = vmatprep.subr.bf16.mxu0 %v796_v0  ;;  %320 = vmatpush1.bf16.msra.mxu1 %v639_v20 }
  0x4d   :  { %321 = vmatprep.subr.bf16.mxu1 %v640_v21 }
  0x4f   :  { %574 = vmatpush3.bf16.msra.mxu0 %v620_v16 }
  0x50   :  { %575 = vmatprep.subr.bf16.mxu0 %v796_v0  ;;  %322 = vmatpush1.bf16.msra.mxu1 %v642_v23 }
  0x51   :  { %323 = vmatprep.subr.bf16.mxu1 %v643_v24 }
  0x53   :  { %576 = vmatpush3.bf16.msra.mxu0 %v621_v19 }
  0x54   :  { %581 = vmatprep.subr.bf16.mxu0 %v796_v0  ;;  %324 = vmatpush1.bf16.msra.mxu1 %v645_v25 }
  0x56   :  { %578 = vmatmul.mubr.bf16.vlgmr.msra.gmra.mxu0 %v87_v22 }
  0x57   :  { %597 = vmatprep.mubr.msk.bf16.mxu0 %vm797_vm0, %v796_v0  ;;  %582 = vmatpush3.bf16.msra.mxu0 %v646_v27 }
  0x58   :  { %583 = vmatprep.subr.bf16.mxu0 %v796_v0 }
  0x5b   :  { %584 = vmatpush3.bf16.msra.mxu0 %v647_v36 }
  0x5c   :  { %585 = vmatprep.subr.bf16.mxu0 %v796_v0 }
  0x5f   :  { %586 = vmatpush3.bf16.msra.mxu0 %v648_v37 }
  0x60   :  { %587 = vmatprep.subr.bf16.mxu0 %v796_v0 }
  0x63   :  { %588 = vmatpush3.bf16.msra.mxu0 %v649_v38 }
  0x64   :  { %589 = vmatprep.subr.bf16.mxu0 %v796_v0 }
  0x67   :  { %590 = vmatpush3.bf16.msra.mxu0 %v650_v39 }
  0x68   :  { %591 = vmatprep.subr.bf16.mxu0 %v796_v0 }
  0x6b   :  { %592 = vmatpush3.bf16.msra.mxu0 %v651_v40 }
  0x6c   :  { %593 = vmatprep.subr.bf16.mxu0 %v796_v0 }
  0x6f   :  { %594 = vmatpush3.bf16.msra.mxu0 %v652_v41 }
  0x70   :  { %595 = vmatprep.subr.bf16.mxu0 %v796_v0 }
  0x73   :  { %596 = vmatpush3.bf16.msra.mxu0 %v653_v42 }
 0x116   :  { %v193_v29 = vpop.f32.mrf.mxu0 }
 0x117   :  { %v194_v30 = vadd.f32 %v509_v28, %v193_v29 }
 0x118   :  { %v579_v31 = vpop.f32.mrf.mxu0 }
 0x119   :  { %v199_v32 = vmax.f32 %v194_v30, 0.0 }
 0x11a   :  { %v196_v33 = vpop.f32.mrf.mxu0 }
 0x11b   :  { %v200_v34 = vpack.c.bf16 %v199_v32, %v199_v32 }
 0x11c   :  { %v580_v35 = vpop.f32.mrf.mxu0 }
 0x11d   :  { %342 = vmatmul.mubr.bf16.vlgmr.msra.gmra.mxu1 %v200_v34 }
 0x1dd   :  { %v343_v50 = vpop.f32.mrf.mxu1 }
 0x1de   :  { %v344_v51 = vadd.f32 %v343_v50, %v222_v48 }
 0x1df   :  { %v345_v52 = vpop.f32.mrf.mxu1 }
 0x1e0   :  { %357 = vst [vmem:[#allocation11] sm:$0xff] %v344_v51  ;;  %v346_v53 = vadd.f32 %v345_v52, %v226_v49 }
 0x1e1   :  { %v347_v54 = vpop.f32.mrf.mxu1 }
 0x1e2   :  { %v352_v55 = vmul.f32 0.5, %v346_v53  ;;  %358 = vst [vmem:[#allocation11 + $0x8] sm:$0xff] %v346_v53 }
 0x1e3   :  { %v348_v56 = vpop.f32.mrf.mxu1 }
 0x1e4   :  { %v353_v57 = vmul.f32 1.442695, %v352_v55 }
 0x1e6   :  { %654 = vpow2.f32 %v353_v57 }
 0x1f3   :  { %v655_v60 = vpop.eup %654 }
 0x1f4   :  { %v355_v61 = vmul.f32 %v655_v60, %v351_v59 }
 0x1f6   :  { %v356_v62 = vadd.f32 %v355_v61, %v344_v51 }
 0x1f8   :  { %v359_v63 = vpack.c.bf16 %v356_v62, %v356_v62 }
 0x1fa   :  { %598 = vmatmul.mubr.bf16.vlgmr.msra.gmra.mxu0 %v359_v63  ;;  %360 = vst [vmem:[#allocation10 + $0x4] sm:$0xf] %v359_v63 }
 0x1fb   :  { %749 = shalt.err (!%p746_p10)
}
 0x1fc   :  { %497 = dma.vmem_to_hbm [thread:$0]  %s495_s13, 256, %s916_s9, [#allocation12]   ;;  %v534_v0 = vld [vmem:[%s913_s6] ss:$0 sm:$0xff] }
 0x1fd   :  { %s800_s18 = smov [#allocation10]  }
 0x1fe   :  { %s484_s19 = sshll.u32 %s800_s18, 4  ;;  %s485_s19 = int_to_ptr.vmem [resolvable:$true] %s484_s19 }
 0x1ff   :  { %s758_s9 = scalar_lea.vmem %s485_s19, 128  ;;  %p763_p12 = scmp.lt.s32.totalorder %s485_s19, %s485_s19 }
 0x200   :  { %p759_p11 = scmp.ne.s32.totalorder %s485_s19, %s758_s9  ;;  %p764_p13 = scmp.lt.s32.totalorder %s758_s9, %s758_s9 }
 0x202   :  { %p765_p0 = por %p764_p13, %p763_p12 }
 0x204   :  { %p766_p1 = pnand %p765_p0, %p759_p11 }
 0x2ba   :  { %v466_v1 = vpop.f32.mrf.mxu0 }
 0x2bb   :  { %v467_v2 = vadd.f32 %v534_v0, %v466_v1 }
 0x2bc   :  { %v599_v3 = vpop.f32.mrf.mxu0 }
 0x2bd   :  { %v472_v4 = vmul.f32 0.5, %v467_v2 }
 0x2be   :  { %v469_v5 = vpop.f32.mrf.mxu0 }
 0x2bf   :  { %656 = vtanh.f32 %v472_v4 }
 0x2c0   :  { %v600_v6 = vpop.f32.mrf.mxu0 }
 0x2cc   :  { %v657_v7 = vpop.eup %656 }
 0x2cd   :  { %v474_v8 = vmul.f32 0.5, %v657_v7 }
 0x2cf   :  { %v475_v9 = vadd.f32 0.5, %v474_v8 }
 0x2d1   :  { %v476_v10 = vpack.c.bf16 %v475_v9, %v475_v9 }
 0x2d3   :  { %477 = vst [vmem:[#allocation10] sm:$0xf] %v476_v10 }
 0x2d4   :  { %769 = shalt.err (!%p766_p1)
}
 0x2d5   :  { %487 = dma.vmem_to_hbm [thread:$0]  %s485_s19, 128, %s915_s8, [#allocation4]  }
 0x2d6   :  { %784 = dma.done.wait [#allocation4], 128  }
 0x2d7   :  { %785 = vsyncadd [#allocation4], 4294967168 }
 0x2d8   :  { %786 = dma.done.wait [#allocation12], 256  }
 0x2d9   :  { %787 = vsyncadd [#allocation12], 4294967040 }
 0x2da   :  { %504 = vsyncpa [#allocation3], 1 }
 0x2db   :  { %505 = vsyncpa [#allocation6], 1 }
 0x2dc   :  { %506 = vsyncpa [#allocation9], 1 }
 0x2dd   :  { %507 = vsyncpa [#allocation4], 1 }
 0x2de   :  { %508 = vsyncpa [#allocation12], 1 }

</bundles_post_ra>
